<compile_context>
chip_gen: v5e
topology: v5e:2x2
jax: 0.10.0
libtpu: 0.0.40
codegen_flags: <defaults>
</compile_context>

<pallas_src>
import functools

import jax
import jax.numpy as jnp
from jax.experimental import pallas as pl
from jax.experimental.pallas import tpu as pltpu


def _round_up(n, m):
    return ((n + m - 1) // m) * m


def _cdiv(a, b):
    return (a + b - 1) // b


def _mlp_kernel(x_ref, w1_ref, b1_ref, w2_ref, b2_ref, o_ref, acc_ref):
    # x_ref:  [tb, tk]        f32/bf16 block (i, k); cast to bf16 in VMEM (hidden under DMA)
    # w1_ref: [tk, h_pad]     bf16 block (k, 0); resident when num_k == 1
    # b1_ref: [1, h_pad]      f32  (constant index -> DMA'd once, resident)
    # w2_ref: [h_pad, o_pad]  bf16 (resident)
    # b2_ref: [1, o_pad]      f32  (resident)
    # o_ref:  [tb, o_pad]     store dtype; same block across the k axis (written on last k)
    # acc_ref:[tb, h_pad]     f32 VMEM scratch accumulator for x @ w1
    k = pl.program_id(1)

    @pl.when(k == 0)
    def _():
        acc_ref[...] = jnp.zeros_like(acc_ref)

    acc_ref[...] += jnp.dot(
        x_ref[...].astype(jnp.bfloat16), w1_ref[...],
        preferred_element_type=jnp.float32)

    @pl.when(k == pl.num_programs(1) - 1)
    def _():
        h = jnp.maximum(acc_ref[...] + b1_ref[...], 0.0)           # f32 bias + ReLU epilogue
        y = jnp.dot(h.astype(jnp.bfloat16), w2_ref[...],
                    preferred_element_type=jnp.float32)
        o_ref[...] = (y + b2_ref[...]).astype(o_ref.dtype)


def prepare_params(w1, b1, w2, b2, *, k_tile=1024):
    """One-time pad + bf16 cast of the Linear parameters (hoisted out of the forward).

    Weights are stored as [in_features, out_features] (PyTorch weight transposed) so
    the kernel computes y = x @ W + b on the MXU.
    """
    in_ch, hidden = w1.shape
    out = w2.shape[1]
    h_pad = _round_up(hidden, 128)               # 200 -> 256
    o_pad = _round_up(out, 128)                  # 10  -> 128

    # K (= in_ch) tiling: chunks of <= k_tile (lane-aligned) so a w1 chunk plus a
    # double-buffered x tile always fits VMEM, even on v7x (64 MiB).
    k_tile = _round_up(min(k_tile, _round_up(in_ch, 128)), 128)
    num_k = _cdiv(in_ch, k_tile)
    tk = _round_up(_cdiv(in_ch, num_k), 128)
    k_pad = num_k * tk

    w1p = jnp.pad(w1, ((0, k_pad - in_ch), (0, h_pad - hidden))).astype(jnp.bfloat16)
    b1p = jnp.pad(b1.reshape(1, -1), ((0, 0), (0, h_pad - hidden))).astype(jnp.float32)
    w2p = jnp.pad(w2, ((0, h_pad - hidden), (0, o_pad - out))).astype(jnp.bfloat16)
    b2p = jnp.pad(b2.reshape(1, -1), ((0, 0), (0, o_pad - out))).astype(jnp.float32)

    return dict(w1=w1p, b1=b1p, w2=w2p, b2=b2p,
                in_ch=in_ch, hidden=hidden, out=out,
                k_pad=k_pad, tk=tk, num_k=num_k, h_pad=h_pad, o_pad=o_pad)


def dense_network_forward(x, params, *, batch_tile=1024, store_dtype=jnp.bfloat16):
    """relu(x.reshape(B, -1) @ w1 + b1) @ w2 + b2 -> f32 [B, 10].

    `params` comes from prepare_params() (pad/cast done once, not per call).
    x enters the kernel in its native f32/bf16 precision; the bf16 cast for the
    MXU happens in VMEM inside the kernel. Set store_dtype=jnp.float32 to store the
    padded output at full precision (costs 2x writeback bytes).
    """
    B = x.shape[0]
    x_flat = x.reshape(B, -1)                    # == x.view(x.shape[0], -1)
    if x_flat.dtype not in (jnp.float32, jnp.bfloat16):
        x_flat = x_flat.astype(jnp.float32)
    assert x_flat.shape[1] == params["in_ch"], (x_flat.shape, params["in_ch"])

    tk, num_k = params["tk"], params["num_k"]
    k_pad, h_pad, o_pad = params["k_pad"], params["h_pad"], params["o_pad"]

    # ---- batch tiling ---------------------------------------------------------
    # Granularity 16 covers both f32 (8) and bf16 (16) sublane packing.  Pick the
    # number of batch tiles so that (a) tiles don't exceed batch_tile, (b) there are
    # >= 2 tiles whenever the batch allows it (v7x megacore: the "parallel" batch
    # axis is split across 2 TensorCores), and (c) padding waste is at most one
    # 16-row remainder (no round-up-to-a-full-tile blowup for awkward B).
    gran = 16
    n_bt = max(_cdiv(B, batch_tile), 1)
    if n_bt < 2 and B >= 2 * gran:
        n_bt = 2
    tb = _round_up(_cdiv(B, n_bt), gran)
    n_bt = _cdiv(B, tb)
    b_pad = n_bt * tb

    pads = ((0, b_pad - B), (0, k_pad - x_flat.shape[1]))
    if any(p for _, p in pads):
        x_flat = jnp.pad(x_flat, pads)           # zero pad -> numerically a no-op

    # ---- explicit VMEM budget (v5e scoped default is only 16 MiB) --------------
    x_bytes = 2 * tb * tk * x_flat.dtype.itemsize
    w1_bytes = 2 * tk * h_pad * 2
    res_bytes = 2 * (h_pad * 4 + h_pad * o_pad * 2 + o_pad * 4)
    o_bytes = 2 * tb * o_pad * jnp.dtype(store_dtype).itemsize
    acc_bytes = tb * h_pad * 4
    footprint = x_bytes + w1_bytes + res_bytes + o_bytes + acc_bytes
    vmem_limit = max(32 << 20, min(int(1.5 * footprint) + (2 << 20), 56 << 20))

    out_padded = pl.pallas_call(
        _mlp_kernel,
        out_shape=jax.ShapeDtypeStruct((b_pad, o_pad), store_dtype),
        grid_spec=pltpu.PrefetchScalarGridSpec(
            num_scalar_prefetch=0,
            grid=(n_bt, num_k),
            in_specs=[
                pl.BlockSpec((tb, tk), lambda i, k: (i, k)),        # x: streamed
                pl.BlockSpec((tk, h_pad), lambda i, k: (k, 0)),     # w1 chunk
                pl.BlockSpec((1, h_pad), lambda i, k: (0, 0)),      # b1: resident
                pl.BlockSpec((h_pad, o_pad), lambda i, k: (0, 0)),  # w2: resident
                pl.BlockSpec((1, o_pad), lambda i, k: (0, 0)),      # b2: resident
            ],
            out_specs=pl.BlockSpec((tb, o_pad), lambda i, k: (i, 0)),
            scratch_shapes=[pltpu.VMEM((tb, h_pad), jnp.float32)],  # x@w1 accumulator
        ),
        compiler_params=pltpu.CompilerParams(
            dimension_semantics=("parallel", "arbitrary"),
            vmem_limit_bytes=vmem_limit,
        ),
    )(x_flat, params["w1"], params["b1"], params["w2"], params["b2"])

    # Slice the real rows/cols back out; return f32 to match the PyTorch module.
    # (Padded batch rows compute relu(b1)@w2+b2 garbage but are dropped here.)
    return out_padded[:B, :params["out"]].astype(jnp.float32)


def init_params(key, in_ch, hidden=200, out=10):
    """Deterministic init mimicking nn.Linear's U(-1/sqrt(fan_in), 1/sqrt(fan_in))."""
    k1, k2, k3, k4 = jax.random.split(key, 4)
    bound1 = 1.0 / jnp.sqrt(jnp.float32(in_ch))
    bound2 = 1.0 / jnp.sqrt(jnp.float32(hidden))
    # Stored as [in, out] (i.e., PyTorch weight transposed).
    w1 = jax.random.uniform(k1, (in_ch, hidden), jnp.float32, -bound1, bound1)
    b1 = jax.random.uniform(k2, (1, hidden), jnp.float32, -bound1, bound1)
    w2 = jax.random.uniform(k3, (hidden, out), jnp.float32, -bound2, bound2)
    b2 = jax.random.uniform(k4, (1, out), jnp.float32, -bound2, bound2)
    return w1, b1, w2, b2


if __name__ == "__main__":
    key = jax.random.PRNGKey(0)
    kx, kp = jax.random.split(key)

    # Small example input consistent with the forward: B=2, C=4, H=W=16 -> in_ch=1024.
    B, C, H, W = 2, 4, 16, 16
    in_ch = C * H * W
    x = jax.random.normal(kx, (B, C, H, W), jnp.float32)

    w1, b1, w2, b2 = init_params(kp, in_ch)
    params = prepare_params(w1, b1, w2, b2)      # one-time weight pad + bf16 cast

    fwd = jax.jit(functools.partial(dense_network_forward, params=params))
    out = jax.block_until_ready(fwd(x))

    # Pure-JAX f32 reference; tolerance covers the intentional bf16 MXU inputs / bf16 store.
    x_flat = x.reshape(B, -1)
    ref = jnp.maximum(x_flat @ w1 + b1, 0.0) @ w2 + b2
    assert out.shape == (B, 10)
    assert out.dtype == jnp.float32
    assert jnp.allclose(out, ref, atol=5e-2, rtol=5e-2), float(jnp.max(jnp.abs(out - ref)))

    print("KERNEL_OK")
</pallas_src>

<mosaic_0001>
module attributes {stable_mosaic.version = 11 : i64} {
  func.func @_mlp_kernel(%arg0: i32, %arg1: i32, %arg2: memref<16x1024xf32, #tpu.memory_space<vmem>>, %arg3: memref<1024x256xbf16, #tpu.memory_space<vmem>>, %arg4: memref<1x256xf32, #tpu.memory_space<vmem>>, %arg5: memref<256x128xbf16, #tpu.memory_space<vmem>>, %arg6: memref<1x128xf32, #tpu.memory_space<vmem>>, %arg7: memref<16x128xbf16, #tpu.memory_space<vmem>>, %arg8: memref<16x256xf32, #tpu.memory_space<vmem>>) attributes {dimension_semantics = [#tpu.dimension_semantics<parallel>, #tpu.dimension_semantics<arbitrary>], iteration_bounds = array<i64: 1, 1>, scalar_prefetch = 0 : i64, scratch_operands = 1 : i64, tpu.core_type = #tpu.core_type<tc>, window_params = [{transform_indices = @transform_0, window_bounds = array<i64: 16, 1024>}, {transform_indices = @transform_1, window_bounds = array<i64: 1024, 256>}, {pipeline_mode = #tpu.pipeline_mode<synchronous>, transform_indices = @transform_2, window_bounds = array<i64: 1, 256>}, {pipeline_mode = #tpu.pipeline_mode<synchronous>, transform_indices = @transform_3, window_bounds = array<i64: 256, 128>}, {pipeline_mode = #tpu.pipeline_mode<synchronous>, transform_indices = @transform_4, window_bounds = array<i64: 1, 128>}, {transform_indices = @transform_5, window_bounds = array<i64: 16, 128>}]} {
    %c0_i32 = arith.constant 0 : i32
    %0 = arith.cmpi eq, %arg1, %c0_i32 : i32
    %1 = arith.extui %0 : i1 to i32
    %c0_i32_0 = arith.constant 0 : i32
    %2 = arith.cmpi ne, %1, %c0_i32_0 : i32
    scf.if %2 {
      %cst_10 = arith.constant 0.000000e+00 : f32
      %13 = vector.broadcast %cst_10 : f32 to vector<16x256xf32>
      %c0_11 = arith.constant 0 : index
      %c0_12 = arith.constant 0 : index
      %14 = vector.load %arg8[%c0_11, %c0_12] : memref<16x256xf32, #tpu.memory_space<vmem>>, vector<16x256xf32>
      tpu.vector_store %arg8[%c0_11, %c0_12], %13 {strides = array<i32>} : memref<16x256xf32, #tpu.memory_space<vmem>>, vector<16x256xf32>,
    } else {
    }
    %c0 = arith.constant 0 : index
    %c0_1 = arith.constant 0 : index
    %3 = vector.load %arg8[%c0, %c0_1] : memref<16x256xf32, #tpu.memory_space<vmem>>, vector<16x256xf32>
    %c0_2 = arith.constant 0 : index
    %c0_3 = arith.constant 0 : index
    %4 = vector.load %arg2[%c0_2, %c0_3] : memref<16x1024xf32, #tpu.memory_space<vmem>>, vector<16x1024xf32>
    %5 = arith.truncf %4 : vector<16x1024xf32> to vector<16x1024xbf16>
    %c0_4 = arith.constant 0 : index
    %c0_5 = arith.constant 0 : index
    %6 = vector.load %arg3[%c0_4, %c0_5] : memref<1024x256xbf16, #tpu.memory_space<vmem>>, vector<1024x256xbf16>
    %cst = arith.constant dense<0.000000e+00> : vector<16x256xf32>
    %7 = tpu.matmul %5, %6, %cst {dimension_numbers = #tpu.dot_dimension_numbers<[1], [0], [0], [1], [0, 0, 1, 1], [], []>} : vector<16x1024xbf16>, vector<1024x256xbf16>, vector<16x256xf32> -> vector<16x256xf32>
    %8 = arith.addf %3, %7 : vector<16x256xf32>
    %c0_6 = arith.constant 0 : index
    %c0_7 = arith.constant 0 : index
    %9 = vector.load %arg8[%c0_6, %c0_7] : memref<16x256xf32, #tpu.memory_space<vmem>>, vector<16x256xf32>
    tpu.vector_store %arg8[%c0_6, %c0_7], %8 {strides = array<i32>} : memref<16x256xf32, #tpu.memory_space<vmem>>, vector<16x256xf32>,
    %c0_i32_8 = arith.constant 0 : i32
    %10 = arith.cmpi eq, %arg1, %c0_i32_8 : i32
    %11 = arith.extui %10 : i1 to i32
    %c0_i32_9 = arith.constant 0 : i32
    %12 = arith.cmpi ne, %11, %c0_i32_9 : i32
    scf.if %12 {
      %c0_10 = arith.constant 0 : index
      %c0_11 = arith.constant 0 : index
      %13 = vector.load %arg8[%c0_10, %c0_11] : memref<16x256xf32, #tpu.memory_space<vmem>>, vector<16x256xf32>
      %c0_12 = arith.constant 0 : index
      %c0_13 = arith.constant 0 : index
      %14 = vector.load %arg4[%c0_12, %c0_13] : memref<1x256xf32, #tpu.memory_space<vmem>>, vector<1x256xf32>
      %15 = vector.broadcast %14 : vector<1x256xf32> to vector<16x256xf32>
      %16 = arith.addf %13, %15 : vector<16x256xf32>
      %cst_14 = arith.constant 0.000000e+00 : f32
      %17 = vector.broadcast %cst_14 : f32 to vector<16x256xf32>
      %18 = arith.maximumf %16, %17 : vector<16x256xf32>
      %19 = arith.truncf %18 : vector<16x256xf32> to vector<16x256xbf16>
      %c0_15 = arith.constant 0 : index
      %c0_16 = arith.constant 0 : index
      %20 = vector.load %arg5[%c0_15, %c0_16] : memref<256x128xbf16, #tpu.memory_space<vmem>>, vector<256x128xbf16>
      %cst_17 = arith.constant dense<0.000000e+00> : vector<16x128xf32>
      %21 = tpu.matmul %19, %20, %cst_17 {dimension_numbers = #tpu.dot_dimension_numbers<[1], [0], [0], [1], [0, 0, 1, 1], [], []>} : vector<16x256xbf16>, vector<256x128xbf16>, vector<16x128xf32> -> vector<16x128xf32>
      %c0_18 = arith.constant 0 : index
      %c0_19 = arith.constant 0 : index
      %22 = vector.load %arg6[%c0_18, %c0_19] : memref<1x128xf32, #tpu.memory_space<vmem>>, vector<1x128xf32>
      %23 = vector.broadcast %22 : vector<1x128xf32> to vector<16x128xf32>
      %24 = arith.addf %21, %23 : vector<16x128xf32>
      %25 = arith.truncf %24 : vector<16x128xf32> to vector<16x128xbf16>
      %c0_20 = arith.constant 0 : index
      %c0_21 = arith.constant 0 : index
      %26 = vector.load %arg7[%c0_20, %c0_21] : memref<16x128xbf16, #tpu.memory_space<vmem>>, vector<16x128xbf16>
      tpu.vector_store %arg7[%c0_20, %c0_21], %25 {strides = array<i32>} : memref<16x128xbf16, #tpu.memory_space<vmem>>, vector<16x128xbf16>,
    } else {
    }
    return
  }
  func.func @transform_0(%arg0: i32, %arg1: i32) -> (i32, i32) {
    %c0_i32 = arith.constant 0 : i32
    return %arg0, %arg1 : i32, i32
  }
  func.func @transform_1(%arg0: i32, %arg1: i32) -> (i32, i32) {
    %c0_i32 = arith.constant 0 : i32
    %c0_i32_0 = arith.constant 0 : i32
    return %arg1, %c0_i32 : i32, i32
  }
  func.func @transform_2(%arg0: i32, %arg1: i32) -> (i32, i32) {
    %c0_i32 = arith.constant 0 : i32
    %c0_i32_0 = arith.constant 0 : i32
    %c0_i32_1 = arith.constant 0 : i32
    return %c0_i32, %c0_i32_0 : i32, i32
  }
  func.func @transform_3(%arg0: i32, %arg1: i32) -> (i32, i32) {
    %c0_i32 = arith.constant 0 : i32
    %c0_i32_0 = arith.constant 0 : i32
    %c0_i32_1 = arith.constant 0 : i32
    return %c0_i32, %c0_i32_0 : i32, i32
  }
  func.func @transform_4(%arg0: i32, %arg1: i32) -> (i32, i32) {
    %c0_i32 = arith.constant 0 : i32
    %c0_i32_0 = arith.constant 0 : i32
    %c0_i32_1 = arith.constant 0 : i32
    return %c0_i32, %c0_i32_0 : i32, i32
  }
  func.func @transform_5(%arg0: i32, %arg1: i32) -> (i32, i32) {
    %c0_i32 = arith.constant 0 : i32
    %c0_i32_0 = arith.constant 0 : i32
    return %arg0, %c0_i32 : i32, i32
  }
}

</mosaic_0001>

<bundles_post_ra>
// kernel: dense_network_forward.1
= control target key start
LH: loop header
LB: loop body
LE: loop exit
PB: predicated region body
PF: predicated region fallthrough
CT: control target
= control target key end

     0   :  { %10 = vsyncpa [#allocation4], 0  ;;  %s2019_s21 = smov [#allocation3]   ;;  %s2020_s23 = smov 128   ;;  %s2196_s0 = inlined_call_operand.vmem [shape: f32[16,1024], index: 0, kind: input, shape index: {}]   ;;  %s2197_s1 = inlined_call_operand.hbm [shape: bf16[1024,256], index: 1, kind: input, shape index: {}]   ;;  %s2198_s2 = inlined_call_operand.vmem [shape: f32[1,256], index: 2, kind: input, shape index: {}]   ;;  %s2199_s3 = inlined_call_operand.vmem [shape: bf16[256,128], index: 3, kind: input, shape index: {}]   ;;  %s2200_s4 = inlined_call_operand.vmem [shape: f32[1,128], index: 4, kind: input, shape index: {}]   ;;  %s2201_s5 = inlined_call_operand.vmem [shape: bf16[16,128], index: 5, kind: output, shape index: {}]  }
   0x1   :  { %s17_s20 = sshll.u32 %s2197_s1, 4  ;;  %s19_s22 = sshll.u32 %s2019_s21, 4  ;;  %s18_s20 = int_to_ptr.hbm [resolvable:$true] %s17_s20  ;;  %s20_s22 = int_to_ptr.vmem [resolvable:$true] %s19_s22 }
   0x2   :  { %s2021_s24 = smov 8  }
   0x3   :  { %25 = dma.hbm_to_vmem [thread:$0]  %s18_s20, 16384, %s20_s22, [#allocation4], %s2020_s23, %s2020_s23, %s2021_s24  }
   0x4   :  { %2017 = dma.done.wait [#allocation4], 16384  }
   0x5   :  { %2018 = vsyncadd [#allocation4], 4294950912  ;;  %v1322_v0 = vld [vmem:[#allocation3 + $0x70] sm:$0xf]  ;;  %v1855_v1 = vld [vmem:[#allocation3 + $0x74] sm:$0xf0] }
   0x6   :  { %v1386_v2 = vld [vmem:[#allocation3 + $0xf0] sm:$0xf]  ;;  %v1323_v3 = vor.u32 %v1855_v1, %v1322_v0  ;;  %v1871_v4 = vld [vmem:[#allocation3 + $0xf4] sm:$0xf0]  ;;  %v1314_v11 = vld [vmem:[#allocation3 + $0x60] sm:$0xf] }
   0x7   :  { %v1450_v5 = vld [vmem:[#allocation3 + $0x170] sm:$0xf]  ;;  %v1887_v6 = vld [vmem:[#allocation3 + $0x174] sm:$0xf0]  ;;  %v1387_v7 = vor.u32 %v1871_v4, %v1386_v2  ;;  %v1853_v13 = vld [vmem:[#allocation3 + $0x64] sm:$0xf0] }
   0x8   :  { %v1451_v8 = vor.u32 %v1887_v6, %v1450_v5  ;;  %v1514_v9 = vld [vmem:[#allocation3 + $0x1f0] sm:$0xf]  ;;  %v1903_v10 = vld [vmem:[#allocation3 + $0x1f4] sm:$0xf0]  ;;  %840 = vmatpush.bf16.msra.mxu0 %v1323_v3  ;;  %v1378_v14 = vld [vmem:[#allocation3 + $0xe0] sm:$0xf]  ;;  %v1315_v16 = vor.u32 %v1853_v13, %v1314_v11 }
   0x9   :  { %v1515_v12 = vor.u32 %v1903_v10, %v1514_v9  ;;  %v1869_v15 = vld [vmem:[#allocation3 + $0xe4] sm:$0xf0]  ;;  %854 = vmatpush.bf16.msra.mxu1 %v1387_v7  ;;  %v1442_v18 = vld [vmem:[#allocation3 + $0x160] sm:$0xf]  ;;  %v1306_v23 = vld [vmem:[#allocation3 + $0x50] sm:$0xf] }
   0xa   :  { %868 = vmatpush.bf16.msra.mxu2 %v1451_v8  ;;  %v1379_v17 = vor.u32 %v1869_v15, %v1378_v14  ;;  %v1885_v19 = vld [vmem:[#allocation3 + $0x164] sm:$0xf0]  ;;  %v1506_v20 = vld [vmem:[#allocation3 + $0x1e0] sm:$0xf]  ;;  %v1851_v24 = vld [vmem:[#allocation3 + $0x54] sm:$0xf0] }
   0xb   :  { %882 = vmatpush.bf16.msra.mxu3 %v1515_v12  ;;  %v1443_v21 = vor.u32 %v1885_v19, %v1442_v18  ;;  %v1901_v22 = vld [vmem:[#allocation3 + $0x1e4] sm:$0xf0]  ;;  %v1370_v26 = vld [vmem:[#allocation3 + $0xd0] sm:$0xf]  ;;  %v1867_v27 = vld [vmem:[#allocation3 + $0xd4] sm:$0xf0]  ;;  %v1307_v29 = vor.u32 %v1851_v24, %v1306_v23 }
   0xc   :  { %v1507_v25 = vor.u32 %v1901_v22, %v1506_v20  ;;  %v1434_v28 = vld [vmem:[#allocation3 + $0x150] sm:$0xf]  ;;  %841 = vmatpush.bf16.msra.mxu0 %v1315_v16  ;;  %v1883_v30 = vld [vmem:[#allocation3 + $0x154] sm:$0xf0]  ;;  %v1371_v33 = vor.u32 %v1867_v27, %v1370_v26  ;;  %v1298_v35 = vld [vmem:[#allocation3 + $0x40] sm:$0xf] }
   0xd   :  { %v1498_v31 = vld [vmem:[#allocation3 + $0x1d0] sm:$0xf]  ;;  %v1899_v32 = vld [vmem:[#allocation3 + $0x1d4] sm:$0xf0]  ;;  %855 = vmatpush.bf16.msra.mxu1 %v1379_v17  ;;  %v1435_v34 = vor.u32 %v1883_v30, %v1434_v28  ;;  %v1849_v36 = vld [vmem:[#allocation3 + $0x44] sm:$0xf0] }
   0xe   :  { %869 = vmatpush.bf16.msra.mxu2 %v1443_v21  ;;  %v1362_v37 = vld [vmem:[#allocation3 + $0xc0] sm:$0xf]  ;;  %v1499_v38 = vor.u32 %v1899_v32, %v1498_v31  ;;  %v1865_v39 = vld [vmem:[#allocation3 + $0xc4] sm:$0xf0]  ;;  %v1299_v44 = vor.u32 %v1849_v36, %v1298_v35  ;;  %v1290_v47 = vld [vmem:[#allocation3 + $0x30] sm:$0xf] }
   0xf   :  { %883 = vmatpush.bf16.msra.mxu3 %v1507_v25  ;;  %v1426_v40 = vld [vmem:[#allocation3 + $0x140] sm:$0xf]  ;;  %v1881_v41 = vld [vmem:[#allocation3 + $0x144] sm:$0xf0]  ;;  %v1363_v45 = vor.u32 %v1865_v39, %v1362_v37  ;;  %v1847_v48 = vld [vmem:[#allocation3 + $0x34] sm:$0xf0] }
  0x10   :  { %v1490_v42 = vld [vmem:[#allocation3 + $0x1c0] sm:$0xf]  ;;  %v1897_v43 = vld [vmem:[#allocation3 + $0x1c4] sm:$0xf0]  ;;  %842 = vmatpush.bf16.msra.mxu0 %v1307_v29  ;;  %v1427_v46 = vor.u32 %v1881_v41, %v1426_v40  ;;  %v1354_v49 = vld [vmem:[#allocation3 + $0xb0] sm:$0xf]  ;;  %v1291_v56 = vor.u32 %v1847_v48, %v1290_v47 }
  0x11   :  { %856 = vmatpush.bf16.msra.mxu1 %v1371_v33  ;;  %v1491_v50 = vor.u32 %v1897_v43, %v1490_v42  ;;  %v1863_v51 = vld [vmem:[#allocation3 + $0xb4] sm:$0xf0]  ;;  %v1418_v52 = vld [vmem:[#allocation3 + $0x130] sm:$0xf]  ;;  %v1282_v59 = vld [vmem:[#allocation3 + $0x20] sm:$0xf] }
  0x12   :  { %870 = vmatpush.bf16.msra.mxu2 %v1435_v34  ;;  %v1879_v53 = vld [vmem:[#allocation3 + $0x134] sm:$0xf0]  ;;  %v1482_v54 = vld [vmem:[#allocation3 + $0x1b0] sm:$0xf]  ;;  %v1355_v57 = vor.u32 %v1863_v51, %v1354_v49  ;;  %v1845_v60 = vld [vmem:[#allocation3 + $0x24] sm:$0xf0] }
  0x13   :  { %884 = vmatpush.bf16.msra.mxu3 %v1499_v38  ;;  %v1895_v55 = vld [vmem:[#allocation3 + $0x1b4] sm:$0xf0]  ;;  %v1419_v58 = vor.u32 %v1879_v53, %v1418_v52  ;;  %v1346_v61 = vld [vmem:[#allocation3 + $0xa0] sm:$0xf]  ;;  %v1861_v63 = vld [vmem:[#allocation3 + $0xa4] sm:$0xf0]  ;;  %v1283_v4 = vor.u32 %v1845_v60, %v1282_v59 }
  0x14   :  { %843 = vmatpush.bf16.msra.mxu0 %v1299_v44  ;;  %v1483_v62 = vor.u32 %v1895_v55, %v1482_v54  ;;  %v1410_v0 = vld [vmem:[#allocation3 + $0x120] sm:$0xf]  ;;  %v1877_v1 = vld [vmem:[#allocation3 + $0x124] sm:$0xf0]  ;;  %v1347_v5 = vor.u32 %v1861_v63, %v1346_v61  ;;  %v1274_v7 = vld [vmem:[#allocation3 + $0x10] sm:$0xf] }
  0x15   :  { %857 = vmatpush.bf16.msra.mxu1 %v1363_v45  ;;  %v1474_v2 = vld [vmem:[#allocation3 + $0x1a0] sm:$0xf]  ;;  %v1893_v3 = vld [vmem:[#allocation3 + $0x1a4] sm:$0xf0]  ;;  %v1411_v6 = vor.u32 %v1877_v1, %v1410_v0  ;;  %v1843_v8 = vld [vmem:[#allocation3 + $0x14] sm:$0xf0] }
  0x16   :  { %871 = vmatpush.bf16.msra.mxu2 %v1427_v46  ;;  %v1338_v9 = vld [vmem:[#allocation3 + $0x90] sm:$0xf]  ;;  %v1475_v10 = vor.u32 %v1893_v3, %v1474_v2  ;;  %v1859_v11 = vld [vmem:[#allocation3 + $0x94] sm:$0xf0]  ;;  %v1275_v16 = vor.u32 %v1843_v8, %v1274_v7  ;;  %v1266_v17 = vld [vmem:[#allocation3] sm:$0xf] }
  0x17   :  { %885 = vmatpush.bf16.msra.mxu3 %v1491_v50  ;;  %v1402_v12 = vld [vmem:[#allocation3 + $0x110] sm:$0xf]  ;;  %v1875_v13 = vld [vmem:[#allocation3 + $0x114] sm:$0xf0]  ;;  %v1841_v18 = vld [vmem:[#allocation3 + $0x4] sm:$0xf0]  ;;  %v1339_v19 = vor.u32 %v1859_v11, %v1338_v9 }
  0x18   :  { %844 = vmatpush.bf16.msra.mxu0 %v1291_v56  ;;  %v1466_v14 = vld [vmem:[#allocation3 + $0x190] sm:$0xf]  ;;  %v1891_v15 = vld [vmem:[#allocation3 + $0x194] sm:$0xf0]  ;;  %v1403_v20 = vor.u32 %v1875_v13, %v1402_v12  ;;  %v1330_v21 = vld [vmem:[#allocation3 + $0x80] sm:$0xf]  ;;  %v1267_v31 = vor.u32 %v1841_v18, %v1266_v17 }
  0x19   :  { %858 = vmatpush.bf16.msra.mxu1 %v1355_v57  ;;  %v1857_v22 = vld [vmem:[#allocation3 + $0x84] sm:$0xf0]  ;;  %v1394_v23 = vld [vmem:[#allocation3 + $0x100] sm:$0xf]  ;;  %v1467_v24 = vor.u32 %v1891_v15, %v1466_v14  ;;  %v1578_v28 = vld [vmem:[#allocation3 + $0x270] sm:$0xf] }
  0x1a   :  { %872 = vmatpush.bf16.msra.mxu2 %v1419_v58  ;;  %v1873_v25 = vld [vmem:[#allocation3 + $0x104] sm:$0xf0]  ;;  %v1458_v26 = vld [vmem:[#allocation3 + $0x180] sm:$0xf]  ;;  %v1919_v29 = vld [vmem:[#allocation3 + $0x274] sm:$0xf0]  ;;  %v1331_v35 = vor.u32 %v1857_v22, %v1330_v21 }
  0x1b   :  { %886 = vmatpush.bf16.msra.mxu3 %v1483_v62  ;;  %v1889_v27 = vld [vmem:[#allocation3 + $0x184] sm:$0xf0]  ;;  %v1642_v30 = vld [vmem:[#allocation3 + $0x2f0] sm:$0xf]  ;;  %v1935_v32 = vld [vmem:[#allocation3 + $0x2f4] sm:$0xf0]  ;;  %v1395_v36 = vor.u32 %v1873_v25, %v1394_v23  ;;  %v1579_v40 = vor.u32 %v1919_v29, %v1578_v28 }
  0x1c   :  { %845 = vmatpush.bf16.msra.mxu0 %v1283_v4  ;;  %v1706_v33 = vld [vmem:[#allocation3 + $0x370] sm:$0xf]  ;;  %v1951_v34 = vld [vmem:[#allocation3 + $0x374] sm:$0xf0]  ;;  %v1459_v39 = vor.u32 %v1889_v27, %v1458_v26  ;;  %v1570_v41 = vld [vmem:[#allocation3 + $0x260] sm:$0xf]  ;;  %v1643_v43 = vor.u32 %v1935_v32, %v1642_v30 }
  0x1d   :  { %859 = vmatpush.bf16.msra.mxu1 %v1347_v5  ;;  %v1770_v37 = vld [vmem:[#allocation3 + $0x3f0] sm:$0xf]  ;;  %v1967_v38 = vld [vmem:[#allocation3 + $0x3f4] sm:$0xf0]  ;;  %v1917_v42 = vld [vmem:[#allocation3 + $0x264] sm:$0xf0]  ;;  %v1707_v44 = vor.u32 %v1951_v34, %v1706_v33 }
  0x1e   :  { %873 = vmatpush.bf16.msra.mxu2 %v1411_v6  ;;  %v1634_v45 = vld [vmem:[#allocation3 + $0x2e0] sm:$0xf]  ;;  %v1933_v46 = vld [vmem:[#allocation3 + $0x2e4] sm:$0xf0]  ;;  %v1771_v48 = vor.u32 %v1967_v38, %v1770_v37  ;;  %v50_v54 = vld [vmem:[%s2196_s0 + $0x10] sm:$0xff]  ;;  %v1571_v55 = vor.u32 %v1917_v42, %v1570_v41 }
  0x1f   :  { %887 = vmatpush.bf16.msra.mxu3 %v1475_v10  ;;  %v1698_v47 = vld [vmem:[#allocation3 + $0x360] sm:$0xf]  ;;  %v1949_v49 = vld [vmem:[#allocation3 + $0x364] sm:$0xf0]  ;;  %v1562_v56 = vld [vmem:[#allocation3 + $0x250] sm:$0xf]  ;;  %v1635_v60 = vor.u32 %v1933_v46, %v1634_v45 }
  0x20   :  { %846 = vmatpush.bf16.msra.mxu0 %v1275_v16  ;;  %v1762_v50 = vld [vmem:[#allocation3 + $0x3e0] sm:$0xf]  ;;  %v1965_v51 = vld [vmem:[#allocation3 + $0x3e4] sm:$0xf0]  ;;  %v1915_v57 = vld [vmem:[#allocation3 + $0x254] sm:$0xf0]  ;;  %v1699_v61 = vor.u32 %v1949_v49, %v1698_v47 }
  0x21   :  { %860 = vmatpush.bf16.msra.mxu1 %v1339_v19  ;;  %v48_v52 = vld [vmem:[%s2196_s0] sm:$0xff]  ;;  %v58_v59 = vld [vmem:[%s2196_s0 + $0x50] sm:$0xff]  ;;  %v1931_v63 = vld [vmem:[#allocation3 + $0x2d4] sm:$0xf0]  ;;  %v1763_v2 = vor.u32 %v1965_v51, %v1762_v50  ;;  %v1563_v9 = vor.u32 %v1915_v57, %v1562_v56 }
  0x22   :  { %874 = vmatpush.bf16.msra.mxu2 %v1403_v20  ;;  %v56_v53 = vld [vmem:[%s2196_s0 + $0x40] sm:$0xff]  ;;  %v1626_v62 = vld [vmem:[#allocation3 + $0x2d0] sm:$0xf]  ;;  %v2069_v1 = vpack.c.bf16 %v58_v59, %v50_v54  ;;  %v1947_v3 = vld [vmem:[#allocation3 + $0x354] sm:$0xf0] }
  0x23   :  { %888 = vmatpush.bf16.msra.mxu3 %v1467_v24  ;;  %v2064_v58 = vpack.c.bf16 %v56_v53, %v48_v52  ;;  %v1690_v0 = vld [vmem:[#allocation3 + $0x350] sm:$0xf]  ;;  %v1963_v5 = vld [vmem:[#allocation3 + $0x3d4] sm:$0xf0]  ;;  %v49_v6 = vld [vmem:[%s2196_s0 + $0x8] sm:$0xff]  ;;  %v1627_v12 = vor.u32 %v1931_v63, %v1626_v62 }
  0x24   :  { %847 = vmatpush.bf16.msra.mxu0 %v1267_v31  ;;  %v1754_v4 = vld [vmem:[#allocation3 + $0x3d0] sm:$0xf]  ;;  %v57_v7 = vld [vmem:[%s2196_s0 + $0x48] sm:$0xff]  ;;  %v51_v8 = vld [vmem:[%s2196_s0 + $0x18] sm:$0xff]  ;;  %v1691_v13 = vor.u32 %v1947_v3, %v1690_v0 }
  0x25   :  { %861 = vmatpush.bf16.msra.mxu1 %v1331_v35  ;;  %v2082_v10 = vpack.c.bf16 %v57_v7, %v49_v6  ;;  %v59_v11 = vld [vmem:[%s2196_s0 + $0x58] sm:$0xff]  ;;  %v1554_v14 = vld [vmem:[#allocation3 + $0x240] sm:$0xf]  ;;  %v1913_v15 = vld [vmem:[#allocation3 + $0x244] sm:$0xf0]  ;;  %v1755_v18 = vor.u32 %v1963_v5, %v1754_v4 }
  0x26   :  { %875 = vmatpush.bf16.msra.mxu2 %v1395_v36  ;;  %v1618_v16 = vld [vmem:[#allocation3 + $0x2c0] sm:$0xf]  ;;  %v2087_v17 = vpack.c.bf16 %v59_v11, %v51_v8  ;;  %v1929_v19 = vld [vmem:[#allocation3 + $0x2c4] sm:$0xf0]  ;;  %v1555_v24 = vor.u32 %v1913_v15, %v1554_v14  ;;  %v1546_v27 = vld [vmem:[#allocation3 + $0x230] sm:$0xf] }
  0x27   :  { %889 = vmatpush.bf16.msra.mxu3 %v1459_v39  ;;  %848 = vmatmul.bf16.vlgmr.msra.gmra.mxu0 %v2064_v58  ;;  %v1682_v20 = vld [vmem:[#allocation3 + $0x340] sm:$0xf]  ;;  %v1945_v21 = vld [vmem:[#allocation3 + $0x344] sm:$0xf0]  ;;  %v1619_v25 = vor.u32 %v1929_v19, %v1618_v16  ;;  %v1911_v28 = vld [vmem:[#allocation3 + $0x234] sm:$0xf0] }
  0x28   :  { %896 = vmatpush.bf16.msrb.mxu0 %v1579_v40  ;;  %862 = vmatmul.bf16.vlgmr.msra.gmra.mxu1 %v2082_v10  ;;  %v1746_v22 = vld [vmem:[#allocation3 + $0x3c0] sm:$0xf]  ;;  %v1961_v23 = vld [vmem:[#allocation3 + $0x3c4] sm:$0xf0]  ;;  %v1683_v26 = vor.u32 %v1945_v21, %v1682_v20  ;;  %v1610_v29 = vld [vmem:[#allocation3 + $0x2b0] sm:$0xf]  ;;  %v1547_v36 = vor.u32 %v1911_v28, %v1546_v27 }
  0x29   :  { %910 = vmatpush.bf16.msrb.mxu1 %v1643_v43  ;;  %876 = vmatmul.bf16.vlgmr.msra.gmra.mxu2 %v2069_v1  ;;  %v1747_v30 = vor.u32 %v1961_v23, %v1746_v22  ;;  %v1927_v31 = vld [vmem:[#allocation3 + $0x2b4] sm:$0xf0]  ;;  %v1674_v32 = vld [vmem:[#allocation3 + $0x330] sm:$0xf]  ;;  %v1538_v39 = vld [vmem:[#allocation3 + $0x220] sm:$0xf] }
  0x2a   :  { %924 = vmatpush.bf16.msrb.mxu2 %v1707_v44  ;;  %890 = vmatmul.bf16.vlgmr.msra.gmra.mxu3 %v2087_v17  ;;  %v1943_v33 = vld [vmem:[#allocation3 + $0x334] sm:$0xf0]  ;;  %v1738_v34 = vld [vmem:[#allocation3 + $0x3b0] sm:$0xf]  ;;  %v1611_v37 = vor.u32 %v1927_v31, %v1610_v29  ;;  %v1909_v40 = vld [vmem:[#allocation3 + $0x224] sm:$0xf0] }
  0x2b   :  { %938 = vmatpush.bf16.msrb.mxu3 %v1771_v48  ;;  %v1959_v35 = vld [vmem:[#allocation3 + $0x3b4] sm:$0xf0]  ;;  %v1675_v38 = vor.u32 %v1943_v33, %v1674_v32  ;;  %v1602_v41 = vld [vmem:[#allocation3 + $0x2a0] sm:$0xf]  ;;  %v1925_v43 = vld [vmem:[#allocation3 + $0x2a4] sm:$0xf0]  ;;  %v1539_v48 = vor.u32 %v1909_v40, %v1538_v39 }
  0x2c   :  { %897 = vmatpush.bf16.msrb.mxu0 %v1571_v55  ;;  %v1739_v42 = vor.u32 %v1959_v35, %v1738_v34  ;;  %v1666_v44 = vld [vmem:[#allocation3 + $0x320] sm:$0xf]  ;;  %v1941_v45 = vld [vmem:[#allocation3 + $0x324] sm:$0xf0]  ;;  %v1530_v49 = vld [vmem:[#allocation3 + $0x210] sm:$0xf]  ;;  %v1603_v50 = vor.u32 %v1925_v43, %v1602_v41 }
  0x2d   :  { %911 = vmatpush.bf16.msrb.mxu1 %v1635_v60  ;;  %v1730_v46 = vld [vmem:[#allocation3 + $0x3a0] sm:$0xf]  ;;  %v1957_v47 = vld [vmem:[#allocation3 + $0x3a4] sm:$0xf0]  ;;  %v1667_v51 = vor.u32 %v1941_v45, %v1666_v44  ;;  %v1907_v52 = vld [vmem:[#allocation3 + $0x214] sm:$0xf0] }
  0x2e   :  { %925 = vmatpush.bf16.msrb.mxu2 %v1699_v61  ;;  %v1594_v53 = vld [vmem:[#allocation3 + $0x290] sm:$0xf]  ;;  %v1923_v54 = vld [vmem:[#allocation3 + $0x294] sm:$0xf0]  ;;  %v1731_v55 = vor.u32 %v1957_v47, %v1730_v46  ;;  %v1522_v61 = vld [vmem:[#allocation3 + $0x200] sm:$0xf]  ;;  %v1531_v63 = vor.u32 %v1907_v52, %v1530_v49 }
  0x2f   :  { %939 = vmatpush.bf16.msrb.mxu3 %v1763_v2  ;;  %v1658_v56 = vld [vmem:[#allocation3 + $0x310] sm:$0xf]  ;;  %v1939_v57 = vld [vmem:[#allocation3 + $0x314] sm:$0xf0]  ;;  %v1905_v62 = vld [vmem:[#allocation3 + $0x204] sm:$0xf0]  ;;  %v1595_v5 = vor.u32 %v1923_v54, %v1594_v53 }
  0x30   :  { %898 = vmatpush.bf16.msrb.mxu0 %v1563_v9  ;;  %v1722_v59 = vld [vmem:[#allocation3 + $0x390] sm:$0xf]  ;;  %v1955_v60 = vld [vmem:[#allocation3 + $0x394] sm:$0xf0]  ;;  %v1586_v0 = vld [vmem:[#allocation3 + $0x280] sm:$0xf]  ;;  %v1659_v6 = vor.u32 %v1939_v57, %v1658_v56  ;;  %v1523_v19 = vor.u32 %v1905_v62, %v1522_v61 }
  0x31   :  { %912 = vmatpush.bf16.msrb.mxu1 %v1627_v12  ;;  %v1921_v2 = vld [vmem:[#allocation3 + $0x284] sm:$0xf0]  ;;  %v1650_v3 = vld [vmem:[#allocation3 + $0x300] sm:$0xf]  ;;  %v1854_v9 = vld [vmem:[#allocation3 + $0x74] sm:$0xf]  ;;  %v1723_v11 = vor.u32 %v1955_v60, %v1722_v59 }
  0x32   :  { %926 = vmatpush.bf16.msrb.mxu2 %v1691_v13  ;;  %v1937_v4 = vld [vmem:[#allocation3 + $0x304] sm:$0xf0]  ;;  %v1714_v7 = vld [vmem:[#allocation3 + $0x380] sm:$0xf]  ;;  %v1324_v12 = vld [vmem:[#allocation3 + $0x78] sm:$0xf0]  ;;  %v1587_v23 = vor.u32 %v1921_v2, %v1586_v0 }
  0x33   :  { %940 = vmatpush.bf16.msrb.mxu3 %v1755_v18  ;;  %v1953_v8 = vld [vmem:[#allocation3 + $0x384] sm:$0xf0]  ;;  %v1870_v13 = vld [vmem:[#allocation3 + $0xf4] sm:$0xf]  ;;  %v1388_v14 = vld [vmem:[#allocation3 + $0xf8] sm:$0xf0]  ;;  %v1327_v29 = vor.u32 %v1854_v9, %v1324_v12 }
  0x34   :  { %899 = vmatpush.bf16.msrb.mxu0 %v1555_v24  ;;  %v1886_v15 = vld [vmem:[#allocation3 + $0x174] sm:$0xf]  ;;  %v1452_v16 = vld [vmem:[#allocation3 + $0x178] sm:$0xf0]  ;;  %v52_v21 = vld [vmem:[%s2196_s0 + $0x20] sm:$0xff]  ;;  %v1651_v24 = vor.u32 %v1937_v4, %v1650_v3  ;;  %v1715_v28 = vor.u32 %v1953_v8, %v1714_v7  ;;  %v1391_v33 = vor.u32 %v1870_v13, %v1388_v14 }
  0x35   :  { %913 = vmatpush.bf16.msrb.mxu1 %v1619_v25  ;;  %v1902_v18 = vld [vmem:[#allocation3 + $0x1f4] sm:$0xf]  ;;  %v1516_v20 = vld [vmem:[#allocation3 + $0x1f8] sm:$0xf0]  ;;  %v60_v22 = vld [vmem:[%s2196_s0 + $0x60] sm:$0xff]  ;;  %v1455_v34 = vor.u32 %v1886_v15, %v1452_v16 }
  0x36   :  { %927 = vmatpush.bf16.msrb.mxu2 %v1683_v26  ;;  %v54_v25 = vld [vmem:[%s2196_s0 + $0x30] sm:$0xff]  ;;  %v53_v27 = vld [vmem:[%s2196_s0 + $0x28] sm:$0xff]  ;;  %v55_v31 = vld [vmem:[%s2196_s0 + $0x38] sm:$0xff]  ;;  %v2115_v39 = vpack.c.bf16 %v60_v22, %v52_v21 }
  0x37   :  { %941 = vmatpush.bf16.msrb.mxu3 %v1747_v30  ;;  %v62_v26 = vld [vmem:[%s2196_s0 + $0x70] sm:$0xff]  ;;  %v61_v30 = vld [vmem:[%s2196_s0 + $0x68] sm:$0xff]  ;;  %v63_v32 = vld [vmem:[%s2196_s0 + $0x78] sm:$0xff] }
  0x38   :  { %900 = vmatpush.bf16.msrb.mxu0 %v1547_v36  ;;  %v1852_v35 = vld [vmem:[#allocation3 + $0x64] sm:$0xf]  ;;  %v1316_v36 = vld [vmem:[#allocation3 + $0x68] sm:$0xf0]  ;;  %v2117_v43 = vpack.c.bf16 %v62_v26, %v54_v25  ;;  %v2119_v44 = vpack.c.bf16 %v61_v30, %v53_v27  ;;  %v2121_v47 = vpack.c.bf16 %v63_v32, %v55_v31  ;;  %v1308_v52 = vld [vmem:[#allocation3 + $0x58] sm:$0xf0] }
  0x39   :  { %914 = vmatpush.bf16.msrb.mxu1 %v1611_v37  ;;  %v1868_v37 = vld [vmem:[#allocation3 + $0xe4] sm:$0xf]  ;;  %v1380_v40 = vld [vmem:[#allocation3 + $0xe8] sm:$0xf0]  ;;  %v1866_v53 = vld [vmem:[#allocation3 + $0xd4] sm:$0xf] }
  0x3a   :  { %928 = vmatpush.bf16.msrb.mxu2 %v1675_v38  ;;  %v1519_v38 = vor.u32 %v1902_v18, %v1516_v20  ;;  %v1884_v41 = vld [vmem:[#allocation3 + $0x164] sm:$0xf]  ;;  %v1508_v46 = vld [vmem:[#allocation3 + $0x1e8] sm:$0xf0]  ;;  %v1383_v49 = vor.u32 %v1868_v37, %v1380_v40  ;;  %v1882_v56 = vld [vmem:[#allocation3 + $0x154] sm:$0xf] }
  0x3b   :  { %942 = vmatpush.bf16.msrb.mxu3 %v1739_v42  ;;  %v1444_v42 = vld [vmem:[#allocation3 + $0x168] sm:$0xf0]  ;;  %v1900_v45 = vld [vmem:[#allocation3 + $0x1e4] sm:$0xf]  ;;  %v1436_v57 = vld [vmem:[#allocation3 + $0x158] sm:$0xf0] }
  0x3c   :  { %901 = vmatpush.bf16.msrb.mxu0 %v1539_v48  ;;  %v1319_v48 = vor.u32 %v1852_v35, %v1316_v36  ;;  %v1511_v54 = vor.u32 %v1900_v45, %v1508_v46  ;;  %v1898_v59 = vld [vmem:[#allocation3 + $0x1d4] sm:$0xf]  ;;  %v1500_v60 = vld [vmem:[#allocation3 + $0x1d8] sm:$0xf0]  ;;  %v1848_v0 = vld [vmem:[#allocation3 + $0x44] sm:$0xf] }
  0x3d   :  { %915 = vmatpush.bf16.msrb.mxu1 %v1603_v50  ;;  %v1447_v50 = vor.u32 %v1884_v41, %v1444_v42  ;;  %v1300_v2 = vld [vmem:[#allocation3 + $0x48] sm:$0xf0]  ;;  %v1864_v3 = vld [vmem:[#allocation3 + $0xc4] sm:$0xf]  ;;  %v1503_v4 = vor.u32 %v1898_v59, %v1500_v60  ;;  %v1846_v14 = vld [vmem:[#allocation3 + $0x34] sm:$0xf] }
  0x3e   :  { %929 = vmatpush.bf16.msrb.mxu2 %v1667_v51  ;;  %v1850_v51 = vld [vmem:[#allocation3 + $0x54] sm:$0xf]  ;;  %v1428_v7 = vld [vmem:[#allocation3 + $0x148] sm:$0xf0]  ;;  %v1896_v8 = vld [vmem:[#allocation3 + $0x1c4] sm:$0xf] }
  0x3f   :  { %943 = vmatpush.bf16.msrb.mxu3 %v1731_v55  ;;  %v1372_v55 = vld [vmem:[#allocation3 + $0xd8] sm:$0xf0]  ;;  %v1311_v61 = vor.u32 %v1850_v51, %v1308_v52  ;;  %v1492_v9 = vld [vmem:[#allocation3 + $0x1c8] sm:$0xf0]  ;;  %v1862_v16 = vld [vmem:[#allocation3 + $0xb4] sm:$0xf] }
  0x40   :  { %902 = vmatpush.bf16.msrb.mxu0 %v1531_v63  ;;  %v1375_v62 = vor.u32 %v1866_v53, %v1372_v55  ;;  %v1439_v63 = vor.u32 %v1882_v56, %v1436_v57  ;;  %v1292_v15 = vld [vmem:[#allocation3 + $0x38] sm:$0xf0]  ;;  %v1495_v18 = vor.u32 %v1896_v8, %v1492_v9  ;;  %v1878_v20 = vld [vmem:[#allocation3 + $0x134] sm:$0xf]  ;;  %v1844_v27 = vld [vmem:[#allocation3 + $0x24] sm:$0xf] }
  0x41   :  { %916 = vmatpush.bf16.msrb.mxu1 %v1595_v5  ;;  %v1364_v5 = vld [vmem:[#allocation3 + $0xc8] sm:$0xf0]  ;;  %v1420_v21 = vld [vmem:[#allocation3 + $0x138] sm:$0xf0]  ;;  %v1894_v22 = vld [vmem:[#allocation3 + $0x1b4] sm:$0xf] }
  0x42   :  { %930 = vmatpush.bf16.msrb.mxu2 %v1659_v6  ;;  %v1880_v6 = vld [vmem:[#allocation3 + $0x144] sm:$0xf]  ;;  %v1367_v12 = vor.u32 %v1864_v3, %v1364_v5  ;;  %v1423_v26 = vor.u32 %v1878_v20, %v1420_v21  ;;  %v1348_v31 = vld [vmem:[#allocation3 + $0xa8] sm:$0xf0]  ;;  %v1842_v40 = vld [vmem:[#allocation3 + $0x14] sm:$0xf] }
  0x43   :  { %944 = vmatpush.bf16.msrb.mxu3 %v1723_v11  ;;  %v1303_v11 = vor.u32 %v1848_v0, %v1300_v2  ;;  %v1431_v13 = vor.u32 %v1880_v6, %v1428_v7  ;;  %v1876_v32 = vld [vmem:[#allocation3 + $0x124] sm:$0xf]  ;;  %v1476_v35 = vld [vmem:[#allocation3 + $0x1a8] sm:$0xf0]  ;;  %v1276_v41 = vld [vmem:[#allocation3 + $0x18] sm:$0xf0] }
  0x44   :  { %903 = vmatpush.bf16.msrb.mxu0 %v1523_v19  ;;  %v1356_v19 = vld [vmem:[#allocation3 + $0xb8] sm:$0xf0]  ;;  %v1858_v42 = vld [vmem:[#allocation3 + $0x94] sm:$0xf]  ;;  %v1279_v52 = vor.u32 %v1842_v40, %v1276_v41  ;;  %v1840_v53 = vld [vmem:[#allocation3 + $0x4] sm:$0xf] }
  0x45   :  { %917 = vmatpush.bf16.msrb.mxu1 %v1587_v23  ;;  %v1484_v23 = vld [vmem:[#allocation3 + $0x1b8] sm:$0xf0]  ;;  %v1359_v25 = vor.u32 %v1862_v16, %v1356_v19  ;;  %v1856_v57 = vld [vmem:[#allocation3 + $0x84] sm:$0xf]  ;;  %v1332_v59 = vld [vmem:[#allocation3 + $0x88] sm:$0xf0] }
  0x46   :  { %931 = vmatpush.bf16.msrb.mxu2 %v1651_v24  ;;  %v1295_v24 = vor.u32 %v1846_v14, %v1292_v15  ;;  %v1487_v30 = vor.u32 %v1894_v22, %v1484_v23  ;;  %v1340_v46 = vld [vmem:[#allocation3 + $0x98] sm:$0xf0]  ;;  %v1872_v60 = vld [vmem:[#allocation3 + $0x104] sm:$0xf]  ;;  %v1460_v0 = vld [vmem:[#allocation3 + $0x188] sm:$0xf0]  ;;  %v1335_v9 = vor.u32 %v1856_v57, %v1332_v59 }
  0x47   :  { %945 = vmatpush.bf16.msrb.mxu3 %v1715_v28  ;;  %904 = vmatmul.bf16.vlgmr.msrb.gmra.mxu0 %v2115_v39  ;;  %v1284_v28 = vld [vmem:[#allocation3 + $0x28] sm:$0xf0]  ;;  %v1468_v51 = vld [vmem:[#allocation3 + $0x198] sm:$0xf0]  ;;  %v1343_v55 = vor.u32 %v1858_v42, %v1340_v46  ;;  %v1918_v2 = vld [vmem:[#allocation3 + $0x274] sm:$0xf] }
  0x48   :  { %952 = vmatpush.bf16.msra.mxu0 %v1327_v29  ;;  %918 = vmatmul.bf16.vlgmr.msrb.gmra.mxu1 %v2119_v44  ;;  %v1860_v29 = vld [vmem:[#allocation3 + $0xa4] sm:$0xf]  ;;  %v1287_v36 = vor.u32 %v1844_v27, %v1284_v28  ;;  %v1580_v3 = vld [vmem:[#allocation3 + $0x278] sm:$0xf0]  ;;  %v1950_v7 = vld [vmem:[#allocation3 + $0x374] sm:$0xf] }
  0x49   :  { %966 = vmatpush.bf16.msra.mxu1 %v1391_v33  ;;  %932 = vmatmul.bf16.vlgmr.msrb.gmra.mxu2 %v2117_v43  ;;  %v1412_v33 = vld [vmem:[#allocation3 + $0x128] sm:$0xf0]  ;;  %v1351_v37 = vor.u32 %v1860_v29, %v1348_v31  ;;  %v1644_v6 = vld [vmem:[#allocation3 + $0x2f8] sm:$0xf0]  ;;  %v1583_v15 = vor.u32 %v1918_v2, %v1580_v3  ;;  %v1916_v16 = vld [vmem:[#allocation3 + $0x264] sm:$0xf] }
  0x4a   :  { %980 = vmatpush.bf16.msra.mxu2 %v1455_v34  ;;  %946 = vmatmul.bf16.vlgmr.msrb.gmra.mxu3 %v2121_v47  ;;  %v1892_v34 = vld [vmem:[#allocation3 + $0x1a4] sm:$0xf]  ;;  %v1708_v8 = vld [vmem:[#allocation3 + $0x378] sm:$0xf0]  ;;  %v1572_v20 = vld [vmem:[#allocation3 + $0x268] sm:$0xf0] }
  0x4b   :  { %994 = vmatpush.bf16.msra.mxu3 %v1519_v38  ;;  %v1415_v38 = vor.u32 %v1876_v32, %v1412_v33  ;;  %v1479_v45 = vor.u32 %v1892_v34, %v1476_v35  ;;  %v1711_v19 = vor.u32 %v1950_v7, %v1708_v8  ;;  %v1932_v21 = vld [vmem:[#allocation3 + $0x2e4] sm:$0xf]  ;;  %v1636_v23 = vld [vmem:[#allocation3 + $0x2e8] sm:$0xf0]  ;;  %v1575_v28 = vor.u32 %v1916_v16, %v1572_v20  ;;  %v1914_v31 = vld [vmem:[#allocation3 + $0x254] sm:$0xf] }
  0x4c   :  { %953 = vmatpush.bf16.msra.mxu0 %v1319_v48  ;;  %v1874_v48 = vld [vmem:[#allocation3 + $0x114] sm:$0xf]  ;;  %v1764_v27 = vld [vmem:[#allocation3 + $0x3e8] sm:$0xf0]  ;;  %v1639_v29 = vor.u32 %v1932_v21, %v1636_v23  ;;  %v1564_v32 = vld [vmem:[#allocation3 + $0x258] sm:$0xf0] }
  0x4d   :  { %967 = vmatpush.bf16.msra.mxu1 %v1383_v49  ;;  %v1404_v49 = vld [vmem:[#allocation3 + $0x118] sm:$0xf0]  ;;  %v1930_v33 = vld [vmem:[#allocation3 + $0x2d4] sm:$0xf]  ;;  %v1567_v41 = vor.u32 %v1914_v31, %v1564_v32  ;;  %v1912_v46 = vld [vmem:[#allocation3 + $0x244] sm:$0xf] }
  0x4e   :  { %981 = vmatpush.bf16.msra.mxu2 %v1447_v50  ;;  %v1890_v50 = vld [vmem:[#allocation3 + $0x194] sm:$0xf]  ;;  %v1407_v56 = vor.u32 %v1874_v48, %v1404_v49  ;;  %v1628_v35 = vld [vmem:[#allocation3 + $0x2d8] sm:$0xf0]  ;;  %v1556_v48 = vld [vmem:[#allocation3 + $0x248] sm:$0xf0] }
  0x4f   :  { %995 = vmatpush.bf16.msra.mxu3 %v1511_v54  ;;  %v1268_v54 = vld [vmem:[#allocation3 + $0x8] sm:$0xf0]  ;;  %v1756_v40 = vld [vmem:[#allocation3 + $0x3d8] sm:$0xf0]  ;;  %v1631_v42 = vor.u32 %v1930_v33, %v1628_v35  ;;  %v1926_v57 = vld [vmem:[#allocation3 + $0x2b4] sm:$0xf] }
  0x50   :  { %954 = vmatpush.bf16.msra.mxu0 %v1311_v61  ;;  %v1471_v61 = vor.u32 %v1890_v50, %v1468_v51  ;;  %v1271_v5 = vor.u32 %v1840_v53, %v1268_v54  ;;  %v1620_v50 = vld [vmem:[#allocation3 + $0x2c8] sm:$0xf0]  ;;  %v1944_v51 = vld [vmem:[#allocation3 + $0x344] sm:$0xf]  ;;  %v1532_v20 = vld [vmem:[#allocation3 + $0x218] sm:$0xf0] }
  0x51   :  { %968 = vmatpush.bf16.msra.mxu1 %v1375_v62  ;;  %v1396_v62 = vld [vmem:[#allocation3 + $0x108] sm:$0xf0]  ;;  %v1924_v7 = vld [vmem:[#allocation3 + $0x2a4] sm:$0xf]  ;;  %v1922_v21 = vld [vmem:[#allocation3 + $0x294] sm:$0xf] }
  0x52   :  { %982 = vmatpush.bf16.msra.mxu2 %v1439_v63  ;;  %v1888_v63 = vld [vmem:[#allocation3 + $0x184] sm:$0xf]  ;;  %v1748_v53 = vld [vmem:[#allocation3 + $0x3c8] sm:$0xf0]  ;;  %v1596_v23 = vld [vmem:[#allocation3 + $0x298] sm:$0xf0] }
  0x53   :  { %996 = vmatpush.bf16.msra.mxu3 %v1503_v4  ;;  %v1934_v4 = vld [vmem:[#allocation3 + $0x2f4] sm:$0xf]  ;;  %v1463_v14 = vor.u32 %v1888_v63, %v1460_v0  ;;  %v1740_v0 = vld [vmem:[#allocation3 + $0x3b8] sm:$0xf0]  ;;  %v1904_v31 = vld [vmem:[#allocation3 + $0x204] sm:$0xf] }
  0x54   :  { %955 = vmatpush.bf16.msra.mxu0 %v1303_v11  ;;  %v1399_v11 = vor.u32 %v1872_v60, %v1396_v62  ;;  %v1612_v60 = vld [vmem:[#allocation3 + $0x2b8] sm:$0xf0]  ;;  %v1958_v63 = vld [vmem:[#allocation3 + $0x3b4] sm:$0xf]  ;;  %v1524_v32 = vld [vmem:[#allocation3 + $0x208] sm:$0xf0] }
  0x55   :  { %969 = vmatpush.bf16.msra.mxu1 %v1367_v12  ;;  %v1966_v12 = vld [vmem:[#allocation3 + $0x3f4] sm:$0xf]  ;;  %v1676_v62 = vld [vmem:[#allocation3 + $0x338] sm:$0xf0]  ;;  %v1615_v3 = vor.u32 %v1926_v57, %v1612_v60  ;;  %v1743_v8 = vor.u32 %v1958_v63, %v1740_v0  ;;  %v1920_v33 = vld [vmem:[#allocation3 + $0x284] sm:$0xf] }
  0x56   :  { %983 = vmatpush.bf16.msra.mxu2 %v1431_v13  ;;  %v1772_v13 = vld [vmem:[#allocation3 + $0x3f8] sm:$0xf0]  ;;  %v1588_v35 = vld [vmem:[#allocation3 + $0x288] sm:$0xf0] }
  0x57   :  { %997 = vmatpush.bf16.msra.mxu3 %v1495_v18  ;;  %v1647_v18 = vor.u32 %v1934_v4, %v1644_v6  ;;  %v1775_v22 = vor.u32 %v1966_v12, %v1772_v13  ;;  %v1540_v6 = vld [vmem:[#allocation3 + $0x228] sm:$0xf0]  ;;  %v1956_v13 = vld [vmem:[#allocation3 + $0x3a4] sm:$0xf] }
  0x58   :  { %956 = vmatpush.bf16.msra.mxu0 %v1295_v24  ;;  %v1948_v24 = vld [vmem:[#allocation3 + $0x364] sm:$0xf]  ;;  %v1668_v12 = vld [vmem:[#allocation3 + $0x328] sm:$0xf0] }
  0x59   :  { %970 = vmatpush.bf16.msra.mxu1 %v1359_v25  ;;  %v1700_v25 = vld [vmem:[#allocation3 + $0x368] sm:$0xf0] }
  0x5a   :  { %984 = vmatpush.bf16.msra.mxu2 %v1423_v26  ;;  %v1964_v26 = vld [vmem:[#allocation3 + $0x3e4] sm:$0xf] }
  0x5b   :  { %998 = vmatpush.bf16.msra.mxu3 %v1487_v30  ;;  %v1703_v30 = vor.u32 %v1948_v24, %v1700_v25  ;;  %v1767_v34 = vor.u32 %v1964_v26, %v1764_v27  ;;  %v1938_v24 = vld [vmem:[#allocation3 + $0x314] sm:$0xf]  ;;  %v1660_v25 = vld [vmem:[#allocation3 + $0x318] sm:$0xf0] }
  0x5c   :  { %957 = vmatpush.bf16.msra.mxu0 %v1287_v36  ;;  %v1946_v36 = vld [vmem:[#allocation3 + $0x354] sm:$0xf]  ;;  %v1724_v27 = vld [vmem:[#allocation3 + $0x398] sm:$0xf0] }
  0x5d   :  { %971 = vmatpush.bf16.msra.mxu1 %v1351_v37  ;;  %v1692_v37 = vld [vmem:[#allocation3 + $0x358] sm:$0xf0]  ;;  %v1954_v26 = vld [vmem:[#allocation3 + $0x394] sm:$0xf] }
  0x5e   :  { %985 = vmatpush.bf16.msra.mxu2 %v1415_v38  ;;  %v1962_v38 = vld [vmem:[#allocation3 + $0x3d4] sm:$0xf] }
  0x5f   :  { %999 = vmatpush.bf16.msra.mxu3 %v1479_v45  ;;  %v1695_v45 = vor.u32 %v1946_v36, %v1692_v37  ;;  %v1759_v49 = vor.u32 %v1962_v38, %v1756_v40  ;;  %v1936_v36 = vld [vmem:[#allocation3 + $0x304] sm:$0xf]  ;;  %v1652_v37 = vld [vmem:[#allocation3 + $0x308] sm:$0xf0] }
  0x60   :  { %958 = vmatpush.bf16.msra.mxu0 %v1279_v52  ;;  %v1960_v52 = vld [vmem:[#allocation3 + $0x3c4] sm:$0xf]  ;;  %v1716_v40 = vld [vmem:[#allocation3 + $0x388] sm:$0xf0] }
  0x61   :  { %972 = vmatpush.bf16.msra.mxu1 %v1343_v55  ;;  %v1910_v55 = vld [vmem:[#allocation3 + $0x234] sm:$0xf]  ;;  %v1751_v59 = vor.u32 %v1960_v52, %v1748_v53  ;;  %v1952_v38 = vld [vmem:[#allocation3 + $0x384] sm:$0xf] }
  0x62   :  { %986 = vmatpush.bf16.msra.mxu2 %v1407_v56  ;;  %v1548_v56 = vld [vmem:[#allocation3 + $0x238] sm:$0xf0] }
  0x63   :  { %1000 = vmatpush.bf16.msra.mxu3 %v1471_v61  ;;  %v1942_v61 = vld [vmem:[#allocation3 + $0x334] sm:$0xf]  ;;  %v1551_v2 = vor.u32 %v1910_v55, %v1548_v56 }
  0x64   :  { %959 = vmatpush.bf16.msra.mxu0 %v1271_v5  ;;  %v1679_v4 = vor.u32 %v1942_v61, %v1676_v62  ;;  %v1908_v5 = vld [vmem:[#allocation3 + $0x224] sm:$0xf] }
  0x65   :  { %973 = vmatpush.bf16.msra.mxu1 %v1335_v9  ;;  %v1604_v9 = vld [vmem:[#allocation3 + $0x2a8] sm:$0xf0] }
  0x66   :  { %987 = vmatpush.bf16.msra.mxu2 %v1399_v11  ;;  %v1940_v11 = vld [vmem:[#allocation3 + $0x324] sm:$0xf]  ;;  %v1607_v16 = vor.u32 %v1924_v7, %v1604_v9  ;;  %v2162_v9 = vld [vmem:[%s2198_s2] sm:$0x3] }
  0x67   :  { %1001 = vmatpush.bf16.msra.mxu3 %v1463_v14  ;;  %960 = vmatmul.bf16.vlgmr.msra.gmra.mxu0 %v2064_v58  ;;  %v1559_v58 = vor.u32 %v1912_v46, %v1556_v48  ;;  %v1732_v14 = vld [vmem:[#allocation3 + $0x3a8] sm:$0xf0]  ;;  %v1719_v46 = vor.u32 %v1952_v38, %v1716_v40  ;;  %v1975_v48 = vld [vmem:[%s2199_s3 + $0x38] sm:$0xff] }
  0x68   :  { %1008 = vmatpush.bf16.msrb.mxu0 %v1583_v15  ;;  %974 = vmatmul.bf16.vlgmr.msra.gmra.mxu1 %v2082_v10  ;;  %v1543_v15 = vor.u32 %v1908_v5, %v1540_v6 }
  0x69   :  { %1022 = vmatpush.bf16.msrb.mxu1 %v1647_v18  ;;  %988 = vmatmul.bf16.vlgmr.msra.gmra.mxu2 %v2069_v1  ;;  %v1928_v1 = vld [vmem:[#allocation3 + $0x2c4] sm:$0xf]  ;;  %v1671_v18 = vor.u32 %v1940_v11, %v1668_v12 }
  0x6a   :  { %1036 = vmatpush.bf16.msrb.mxu2 %v1711_v19  ;;  %1002 = vmatmul.bf16.vlgmr.msra.gmra.mxu3 %v2087_v17  ;;  %v1684_v17 = vld [vmem:[#allocation3 + $0x348] sm:$0xf0]  ;;  %v1623_v54 = vor.u32 %v1928_v1, %v1620_v50  ;;  %v1906_v19 = vld [vmem:[#allocation3 + $0x214] sm:$0xf] }
  0x6b   :  { %1050 = vmatpush.bf16.msrb.mxu3 %v1775_v22  ;;  %v1687_v10 = vor.u32 %v1944_v51, %v1684_v17  ;;  %v1735_v22 = vor.u32 %v1956_v13, %v1732_v14  ;;  %v1974_v1 = vld [vmem:[%s2199_s3 + $0x30] sm:$0xff]  ;;  %v1969_v17 = vld [vmem:[%s2199_s3 + $0x8] sm:$0xff]  ;;  %v1081_v13 = vperm.slane %v2162_v9, 0 }
  0x6c   :  { %1009 = vmatpush.bf16.msrb.mxu0 %v1575_v28  ;;  %v1535_v28 = vor.u32 %v1906_v19, %v1532_v20  ;;  %v1970_v50 = vld [vmem:[%s2199_s3 + $0x10] sm:$0xff] }
  0x6d   :  { %1023 = vmatpush.bf16.msrb.mxu1 %v1639_v29  ;;  %v1599_v29 = vor.u32 %v1922_v21, %v1596_v23  ;;  %v1982_v20 = vld [vmem:[%s2199_s3 + $0x70] sm:$0xff] }
  0x6e   :  { %1037 = vmatpush.bf16.msrb.mxu2 %v1703_v30  ;;  %v1663_v30 = vor.u32 %v1938_v24, %v1660_v25 }
  0x6f   :  { %1051 = vmatpush.bf16.msrb.mxu3 %v1767_v34  ;;  %v1727_v34 = vor.u32 %v1954_v26, %v1724_v27  ;;  %v1981_v27 = vld [vmem:[%s2199_s3 + $0x68] sm:$0xff] }
  0x70   :  { %1010 = vmatpush.bf16.msrb.mxu0 %v1567_v41  ;;  %v1527_v41 = vor.u32 %v1904_v31, %v1524_v32  ;;  %v1978_v31 = vld [vmem:[%s2199_s3 + $0x50] sm:$0xff] }
  0x71   :  { %1024 = vmatpush.bf16.msrb.mxu1 %v1631_v42  ;;  %v1591_v42 = vor.u32 %v1920_v33, %v1588_v35  ;;  %v1977_v33 = vld [vmem:[%s2199_s3 + $0x48] sm:$0xff] }
  0x72   :  { %1038 = vmatpush.bf16.msrb.mxu2 %v1695_v45  ;;  %v1655_v45 = vor.u32 %v1936_v36, %v1652_v37  ;;  %v1976_v36 = vld [vmem:[%s2199_s3 + $0x40] sm:$0xff] }
  0x73   :  { %1052 = vmatpush.bf16.msrb.mxu3 %v1759_v49 }
  0x74   :  { %1011 = vmatpush.bf16.msrb.mxu0 %v1559_v58 }
  0x75   :  { %1025 = vmatpush.bf16.msrb.mxu1 %v1623_v54 }
  0x76   :  { %1039 = vmatpush.bf16.msrb.mxu2 %v1687_v10  ;;  %v1968_v10 = vld [vmem:[%s2199_s3] sm:$0xff] }
  0x77   :  { %1053 = vmatpush.bf16.msrb.mxu3 %v1751_v59 }
  0x78   :  { %1012 = vmatpush.bf16.msrb.mxu0 %v1551_v2 }
  0x79   :  { %1026 = vmatpush.bf16.msrb.mxu1 %v1615_v3 }
  0x7a   :  { %1040 = vmatpush.bf16.msrb.mxu2 %v1679_v4 }
  0x7b   :  { %1054 = vmatpush.bf16.msrb.mxu3 %v1743_v8 }
  0x7c   :  { %1013 = vmatpush.bf16.msrb.mxu0 %v1543_v15 }
  0x7d   :  { %1027 = vmatpush.bf16.msrb.mxu1 %v1607_v16  ;;  %v1983_v16 = vld [vmem:[%s2199_s3 + $0x78] sm:$0xff] }
  0x7e   :  { %1041 = vmatpush.bf16.msrb.mxu2 %v1671_v18 }
  0x7f   :  { %1055 = vmatpush.bf16.msrb.mxu3 %v1735_v22 }
  0x80   :  { %1014 = vmatpush.bf16.msrb.mxu0 %v1535_v28  ;;  %v1980_v28 = vld [vmem:[%s2199_s3 + $0x60] sm:$0xff] }
  0x81   :  { %1028 = vmatpush.bf16.msrb.mxu1 %v1599_v29  ;;  %v1979_v29 = vld [vmem:[%s2199_s3 + $0x58] sm:$0xff] }
  0x82   :  { %1042 = vmatpush.bf16.msrb.mxu2 %v1663_v30 }
  0x83   :  { %1056 = vmatpush.bf16.msrb.mxu3 %v1727_v34 }
  0x84   :  { %1015 = vmatpush.bf16.msrb.mxu0 %v1527_v41 }
  0x85   :  { %1029 = vmatpush.bf16.msrb.mxu1 %v1591_v42 }
  0x86   :  { %1043 = vmatpush.bf16.msrb.mxu2 %v1655_v45 }
  0x87   :  { %1057 = vmatpush.bf16.msrb.mxu3 %v1719_v46  ;;  %1016 = vmatmul.bf16.vlgmr.msrb.gmra.mxu0 %v2115_v39  ;;  %v1973_v39 = vld [vmem:[%s2199_s3 + $0x28] sm:$0xff] }
  0x88   :  { %1030 = vmatmul.bf16.vlgmr.msrb.gmra.mxu1 %v2119_v44  ;;  %1227 = vmatpush.bf16.msra.mxu0 %v1975_v48  ;;  %v1971_v44 = vld [vmem:[%s2199_s3 + $0x18] sm:$0xff] }
  0x89   :  { %1044 = vmatmul.bf16.vlgmr.msrb.gmra.mxu2 %v2117_v43  ;;  %v1972_v43 = vld [vmem:[%s2199_s3 + $0x20] sm:$0xff]  ;;  %1241 = vmatpush.bf16.msra.mxu1 %v1983_v16 }
  0x8a   :  { %1058 = vmatmul.bf16.vlgmr.msrb.gmra.mxu3 %v2121_v47 }
  0x8c   :  { %1228 = vmatpush.bf16.msra.mxu0 %v1974_v1 }
  0x8d   :  { %1242 = vmatpush.bf16.msra.mxu1 %v1982_v20 }
  0x90   :  { %1229 = vmatpush.bf16.msra.mxu0 %v1973_v39 }
  0x91   :  { %1243 = vmatpush.bf16.msra.mxu1 %v1981_v27 }
  0x94   :  { %1230 = vmatpush.bf16.msra.mxu0 %v1972_v43 }
  0x95   :  { %1244 = vmatpush.bf16.msra.mxu1 %v1980_v28 }
  0x98   :  { %1231 = vmatpush.bf16.msra.mxu0 %v1971_v44 }
  0x99   :  { %1245 = vmatpush.bf16.msra.mxu1 %v1979_v29 }
  0x9c   :  { %1232 = vmatpush.bf16.msra.mxu0 %v1970_v50 }
  0x9d   :  { %1246 = vmatpush.bf16.msra.mxu1 %v1978_v31 }
  0xa0   :  { %1233 = vmatpush.bf16.msra.mxu0 %v1969_v17 }
  0xa1   :  { %1247 = vmatpush.bf16.msra.mxu1 %v1977_v33 }
  0xa4   :  { %v849_v47 = vpop.f32.mrf.mxu0  ;;  %1234 = vmatpush.bf16.msra.mxu0 %v1968_v10  ;;  %v1082_v10 = vperm.slane %v2162_v9, 1 }
  0xa5   :  { %v863_v49 = vpop.f32.mrf.mxu1  ;;  %1248 = vmatpush.bf16.msra.mxu1 %v1976_v36 }
  0xa6   :  { %v864_v53 = vadd.f32 %v863_v49, %v849_v47 }
  0xac   :  { %v877_v51 = vpop.f32.mrf.mxu2  ;;  %v851_v58 = vpop.f32.mrf.mxu0 }
  0xad   :  { %v891_v52 = vpop.f32.mrf.mxu3  ;;  %v865_v54 = vpop.f32.mrf.mxu1  ;;  %v878_v55 = vadd.f32 %v877_v51, %v864_v53 }
  0xae   :  { %v866_v60 = vadd.f32 %v865_v54, %v851_v58 }
  0xaf   :  { %v892_v57 = vadd.f32 %v891_v52, %v878_v55 }
  0xb4   :  { %v879_v56 = vpop.f32.mrf.mxu2 }
  0xb5   :  { %v893_v59 = vpop.f32.mrf.mxu3  ;;  %v880_v0 = vadd.f32 %v879_v56, %v866_v60 }
  0xb7   :  { %v894_v4 = vadd.f32 %v893_v59, %v880_v0 }
  0xc4   :  { %v905_v61 = vpop.f32.mrf.mxu0 }
  0xc5   :  { %v919_v62 = vpop.f32.mrf.mxu1  ;;  %v906_v63 = vadd.f32 %v905_v61, %v892_v57 }
  0xc7   :  { %v920_v2 = vadd.f32 %v919_v62, %v906_v63 }
  0xcc   :  { %v933_v3 = vpop.f32.mrf.mxu2  ;;  %v907_v5 = vpop.f32.mrf.mxu0 }
  0xcd   :  { %v947_v6 = vpop.f32.mrf.mxu3  ;;  %v934_v7 = vadd.f32 %v933_v3, %v920_v2  ;;  %v908_v8 = vadd.f32 %v907_v5, %v894_v4  ;;  %v921_v11 = vpop.f32.mrf.mxu1  ;;  %v1992_v5 = vld [vmem:[%s2200_s4] ss:$0 sm:$0xff] }
  0xcf   :  { %v948_v12 = vadd.f32 %v947_v6, %v934_v7  ;;  %v922_v14 = vadd.f32 %v921_v11, %v908_v8 }
  0xd1   :  { %v1085_v21 = vadd.f32 %v1081_v13, %v948_v12 }
  0xd3   :  { %v1089_v24 = vmax.f32 %v1085_v21, 0.0 }
  0xd4   :  { %v935_v15 = vpop.f32.mrf.mxu2 }
  0xd5   :  { %v936_v18 = vadd.f32 %v935_v15, %v922_v14  ;;  %v949_v19 = vpop.f32.mrf.mxu3 }
  0xd7   :  { %v950_v22 = vadd.f32 %v949_v19, %v936_v18 }
  0xd9   :  { %v1087_v23 = vadd.f32 %v1081_v13, %v950_v22 }
  0xdb   :  { %v1091_v25 = vmax.f32 %v1087_v23, 0.0 }
  0xdd   :  { %v1093_v26 = vpack.c.bf16 %v1091_v25, %v1089_v24 }
  0xdf   :  { %1235 = vmatmul.bf16.vlgmr.msra.gmra.mxu0 %v1093_v26 }
  0xe4   :  { %v961_v30 = vpop.f32.mrf.mxu0 }
  0xe5   :  { %v975_v32 = vpop.f32.mrf.mxu1 }
  0xe6   :  { %v976_v38 = vadd.f32 %v975_v32, %v961_v30 }
  0xec   :  { %v989_v34 = vpop.f32.mrf.mxu2  ;;  %v963_v37 = vpop.f32.mrf.mxu0 }
  0xed   :  { %v1003_v35 = vpop.f32.mrf.mxu3  ;;  %v977_v40 = vpop.f32.mrf.mxu1  ;;  %v990_v41 = vadd.f32 %v989_v34, %v976_v38 }
  0xee   :  { %v978_v45 = vadd.f32 %v977_v40, %v963_v37 }
  0xef   :  { %v1004_v1 = vadd.f32 %v1003_v35, %v990_v41 }
  0xf4   :  { %v991_v42 = vpop.f32.mrf.mxu2 }
  0xf5   :  { %v1005_v46 = vpop.f32.mrf.mxu3  ;;  %v992_v43 = vadd.f32 %v991_v42, %v978_v45 }
  0xf7   :  { %v1006_v49 = vadd.f32 %v1005_v46, %v992_v43 }
 0x104   :  { %v1017_v48 = vpop.f32.mrf.mxu0 }
 0x105   :  { %v1031_v39 = vpop.f32.mrf.mxu1  ;;  %v1018_v44 = vadd.f32 %v1017_v48, %v1004_v1 }
 0x107   :  { %v1032_v50 = vadd.f32 %v1031_v39, %v1018_v44 }
 0x10c   :  { %v1045_v47 = vpop.f32.mrf.mxu2  ;;  %v1019_v17 = vpop.f32.mrf.mxu0 }
 0x10d   :  { %v1059_v51 = vpop.f32.mrf.mxu3  ;;  %v1046_v52 = vadd.f32 %v1045_v47, %v1032_v50  ;;  %v1020_v53 = vadd.f32 %v1019_v17, %v1006_v49  ;;  %v1033_v58 = vpop.f32.mrf.mxu1 }
 0x10f   :  { %v1060_v54 = vadd.f32 %v1059_v51, %v1046_v52  ;;  %v1034_v55 = vadd.f32 %v1033_v58, %v1020_v53 }
 0x111   :  { %v1086_v60 = vadd.f32 %v1082_v10, %v1060_v54 }
 0x113   :  { %v1090_v63 = vmax.f32 %v1086_v60, 0.0 }
 0x114   :  { %v1047_v56 = vpop.f32.mrf.mxu2 }
 0x115   :  { %v1048_v57 = vadd.f32 %v1047_v56, %v1034_v55  ;;  %v1061_v59 = vpop.f32.mrf.mxu3 }
 0x117   :  { %v1062_v61 = vadd.f32 %v1061_v59, %v1048_v57 }
 0x119   :  { %v1088_v62 = vadd.f32 %v1082_v10, %v1062_v61 }
 0x11b   :  { %v1092_v0 = vmax.f32 %v1088_v62, 0.0 }
 0x11d   :  { %v1094_v2 = vpack.c.bf16 %v1092_v0, %v1090_v63 }
 0x11f   :  { %1249 = vmatmul.bf16.vlgmr.msra.gmra.mxu1 %v1094_v2 }
 0x15c   :  { %v1236_v3 = vpop.f32.mrf.mxu0 }
 0x15d   :  { %v1237_v7 = vadd.f32 %v1992_v5, %v1236_v3 }
 0x164   :  { %v1238_v6 = vpop.f32.mrf.mxu0 }
 0x165   :  { %v1239_v8 = vadd.f32 %v1992_v5, %v1238_v6 }
 0x19c   :  { %v1250_v4 = vpop.f32.mrf.mxu1 }
 0x19d   :  { %v1251_v11 = vadd.f32 %v1250_v4, %v1237_v7 }
 0x1a4   :  { %v1252_v9 = vpop.f32.mrf.mxu1 }
 0x1a5   :  { %v1253_v12 = vadd.f32 %v1252_v9, %v1239_v8 }
 0x1a7   :  { %v1987_v13 = vpack.c.bf16 %v1253_v12, %v1251_v11 }
 0x1a9   :  { %1988 = vst [vmem:[%s2201_s5] sm:$0xff] %v1987_v13  }
 0x1aa   :  { %1263 = vsyncpa [#allocation4], 1 }

</bundles_post_ra>
